<compile_context>
chip_gen: v6e
topology: v6e:2x2x1
jax: 0.10.0
libtpu: 0.0.40
codegen_flags: <defaults>
</compile_context>

<pallas_src>
import jax
import jax.numpy as jnp
from jax.experimental import pallas as pl
from jax.experimental.pallas import tpu as pltpu

_LANE = 128          # lane width / padded output-class count
_NEG_BIG = -1e30     # bias for fake output classes (exp() underflows to 0)


def similarity_linear_kernel(s1_ref, s2_ref, wh_ref, bh_ref, wo_ref, bo_ref,
                             out_ref):
    """s1/s2: (tm, E) f32; wh: (4E, Hp) bf16; bh: (1, Hp) f32;
    wo: (Hp, 128) bf16; bo: (1, 128) f32; out: (tm, 128) f32."""
    s1 = s1_ref[...]
    s2 = s2_ref[...]

    mult_dist = s1 * s2                   # torch.mul(sent1vec, sent2vec)
    abs_dist = jnp.abs(s1 - s2)           # torch.abs(sent1vec - sent2vec)

    # cat(s1, s2, mult, abs) -> single fused K = 4E MXU matmul (bf16 in, f32 acc).
    vec = jnp.concatenate([s1, s2, mult_dist, abs_dist],
                          axis=-1).astype(jnp.bfloat16)
    h = jnp.dot(vec, wh_ref[...],
                preferred_element_type=jnp.float32) + bh_ref[...]   # (tm, Hp)

    # Sigmoid via tanh identity (exact, single EUP op, no divide).
    h = 0.5 * (jnp.tanh(0.5 * h) + 1.0)

    # Second matmul; padded hidden rows of Wo are zero so the sigmoid(0)=0.5
    # values in the padded columns of h contribute nothing.
    o = jnp.dot(h.astype(jnp.bfloat16), wo_ref[...],
                preferred_element_type=jnp.float32) + bo_ref[...]   # (tm, 128)

    # LogSoftmax(dim=-1), max-shifted. Fake classes have logit -1e30 -> exp = 0,
    # so the result over the 5 real classes is exact.
    m = jnp.max(o, axis=-1, keepdims=True)
    shifted = o - m
    lse = jnp.log(jnp.sum(jnp.exp(shifted), axis=-1, keepdims=True))
    out_ref[...] = shifted - lse


def _round_up(x, m):
    return ((x + m - 1) // m) * m


def _tensorcores_per_chip():
    """Best-effort: 2 on v7x (2 TCs/chip), 1 elsewhere."""
    try:
        kind = jax.devices()[0].device_kind.lower()
    except Exception:
        return 1
    return 2 if ("v7" in kind or "tpu7" in kind) else 1


def prepare_params(wh, bh, wo, bo):
    """One-time param layout, off the hot path.

    wh: (4E, H) (torch weight transposed), bh: (H,), wo: (H, 5), bo: (5,).
    Returns (wh_pad bf16 (4E, Hp), bh_pad f32 (1, Hp),
             wo_pad bf16 (Hp, 128), bo_pad f32 (1, 128), n_out).
    """
    wh = jnp.asarray(wh, jnp.float32)
    bh = jnp.asarray(bh, jnp.float32)
    wo = jnp.asarray(wo, jnp.float32)
    bo = jnp.asarray(bo, jnp.float32)
    four_e, hidden = wh.shape
    n_out = wo.shape[1]
    h_pad = _round_up(hidden, _LANE)

    # Hidden dim zero-padded to a lane multiple: padded h columns see zero
    # weights+bias -> sigmoid(0)=0.5, but the matching rows of wo_pad are zero.
    wh_pad = jnp.zeros((four_e, h_pad), jnp.float32).at[:, :hidden].set(wh)
    bh_pad = jnp.zeros((1, h_pad), jnp.float32).at[0, :hidden].set(bh)

    # Output dim padded to 128 lanes: zero weights, -1e30 bias for fake classes.
    wo_pad = jnp.zeros((h_pad, _LANE), jnp.float32).at[:hidden, :n_out].set(wo)
    bo_pad = jnp.full((1, _LANE), _NEG_BIG, jnp.float32).at[0, :n_out].set(bo)

    return (wh_pad.astype(jnp.bfloat16), bh_pad,
            wo_pad.astype(jnp.bfloat16), bo_pad, n_out)


def _vmem_limit_bytes(tile_m, embed, h_pad, n_pad):
    act = 2 * 2 * tile_m * embed * 4                    # s1 + s2, double-buffered f32
    out = 2 * tile_m * n_pad * 4                        # output, double-buffered f32
    wts = 2 * 2 * (4 * embed * h_pad + h_pad * n_pad)   # bf16 weights (allow 2 bufs)
    bias = 2 * 2 * (h_pad + n_pad) * 4
    tmp = 4 * tile_m * (4 * embed + 2 * h_pad + 2 * n_pad)  # in-kernel temporaries
    needed = act + out + wts + bias + tmp + (2 << 20)
    # Never go below the 32 MiB default; stay under v7x's 64 MiB physical VMEM.
    return max(min(needed, 60 * 1024 * 1024), 32 * 1024 * 1024)


def _make_call(*, tile_m, embed, h_pad, n_pad, b_pad, vmem_limit, weight_mode):
    wkw = {} if weight_mode is None else {"pipeline_mode": weight_mode}
    in_specs = [
        # activations: one (tile_m, E) slab per grid step, per input
        pl.BlockSpec((tile_m, embed), lambda i: (i, 0)),
        pl.BlockSpec((tile_m, embed), lambda i: (i, 0)),
        # weights / biases: constant index_map -> DMA'd once, VMEM-resident
        pl.BlockSpec((4 * embed, h_pad), lambda i: (0, 0), **wkw),
        pl.BlockSpec((1, h_pad), lambda i: (0, 0), **wkw),
        pl.BlockSpec((h_pad, n_pad), lambda i: (0, 0), **wkw),
        pl.BlockSpec((1, n_pad), lambda i: (0, 0), **wkw),
    ]
    return pl.pallas_call(
        similarity_linear_kernel,
        out_shape=jax.ShapeDtypeStruct((b_pad, n_pad), jnp.float32),
        grid_spec=pltpu.PrefetchScalarGridSpec(
            num_scalar_prefetch=0,
            grid=(b_pad // tile_m,),
            in_specs=in_specs,
            out_specs=pl.BlockSpec((tile_m, n_pad), lambda i: (i, 0)),
        ),
        compiler_params=pltpu.CompilerParams(
            dimension_semantics=("parallel",),
            vmem_limit_bytes=vmem_limit),
    )


def similarity_linear_forward(sent1vec, sent2vec, prepared_params, *, tm=512):
    """sent1vec/sent2vec: (E,) or (B, E). Returns (5,) or (B, 5) log-probs."""
    wh_pad, bh_pad, wo_pad, bo_pad, n_out = prepared_params

    single = sent1vec.ndim == 1
    s1 = jnp.atleast_2d(sent1vec).astype(jnp.float32)
    s2 = jnp.atleast_2d(sent2vec).astype(jnp.float32)
    batch, embed = s1.shape
    four_e, h_pad = wh_pad.shape
    n_pad = wo_pad.shape[1]
    assert four_e == 4 * embed
    assert wo_pad.shape[0] == h_pad

    # Batch tile: multiple of 8, as large as possible (overhead-bound kernel).
    tile_m = min(tm, _round_up(batch, 8))
    # v7x only: keep >= 2 grid steps so the "parallel" axis maps onto both TCs.
    if _tensorcores_per_chip() >= 2 and batch > 8:
        tile_m = min(tile_m, _round_up(pl.cdiv(_round_up(batch, 8), 2), 8))
    b_pad = _round_up(batch, tile_m)

    if b_pad != batch:
        pad = ((0, b_pad - batch), (0, 0))
        s1 = jnp.pad(s1, pad)
        s2 = jnp.pad(s2, pad)

    vmem_limit = _vmem_limit_bytes(tile_m, embed, h_pad, n_pad)
    call_kwargs = dict(tile_m=tile_m, embed=embed, h_pad=h_pad, n_pad=n_pad,
                       b_pad=b_pad, vmem_limit=vmem_limit)
    args = (s1, s2, wh_pad, bh_pad, wo_pad, bo_pad)

    try:
        # Single-buffer the constant weight/bias operands (halves their VMEM
        # footprint; they never change across grid steps).
        out = _make_call(weight_mode=pl.Buffered(1), **call_kwargs)(*args)
    except Exception:
        # Fallback: default double-buffered pipelining if pipeline_mode /
        # Buffered(1) is not supported by the installed jax.
        out = _make_call(weight_mode=None, **call_kwargs)(*args)

    out = out[:batch, :n_out]
    return out[0] if single else out


def init_params(key, embed_size, hidden_size):
    """Deterministic init mirroring torch.nn.Linear default (uniform ±1/sqrt(fan_in))."""
    k1, k2, k3, k4 = jax.random.split(key, 4)
    kh = 1.0 / jnp.sqrt(4.0 * embed_size)
    ko = 1.0 / jnp.sqrt(float(hidden_size))
    # stored as (in_features, out_features) == torch weight transposed
    wh = jax.random.uniform(k1, (4 * embed_size, hidden_size),
                            minval=-kh, maxval=kh, dtype=jnp.float32)
    bh = jax.random.uniform(k2, (hidden_size,),
                            minval=-kh, maxval=kh, dtype=jnp.float32)
    wo = jax.random.uniform(k3, (hidden_size, 5),
                            minval=-ko, maxval=ko, dtype=jnp.float32)
    bo = jax.random.uniform(k4, (5,),
                            minval=-ko, maxval=ko, dtype=jnp.float32)
    return wh, bh, wo, bo


def _reference_forward(s1, s2, params):
    """Pure-JAX f32 reference of the torch forward (row-wise)."""
    wh, bh, wo, bo = params
    mult = s1 * s2
    absd = jnp.abs(s1 - s2)
    vec = jnp.concatenate([s1, s2, mult, absd], axis=-1)
    h = jax.nn.sigmoid(
        jnp.dot(vec, wh, precision=jax.lax.Precision.HIGHEST) + bh)
    o = jnp.dot(h, wo, precision=jax.lax.Precision.HIGHEST) + bo
    return jax.nn.log_softmax(o, axis=-1)


if __name__ == "__main__":
    embed_size = 32
    hidden_size = 32
    batch = 8

    key = jax.random.PRNGKey(0)
    kp, k1, k2 = jax.random.split(key, 3)
    params = init_params(kp, embed_size, hidden_size)
    prepared = prepare_params(*params)   # one-time layout, off the hot path

    sent1 = jax.random.normal(k1, (batch, embed_size), dtype=jnp.float32)
    sent2 = jax.random.normal(k2, (batch, embed_size), dtype=jnp.float32)

    out = similarity_linear_forward(sent1, sent2, prepared)
    out = jax.block_until_ready(out)

    ref = _reference_forward(sent1, sent2, params)

    assert out.shape == (batch, 5)
    # log-softmax output sums to ~1 in prob space (padded classes contribute 0)
    assert jnp.allclose(jnp.sum(jnp.exp(out), axis=-1), 1.0, atol=1e-5)
    # matches the f32 reference (bf16 MXU inputs, f32 accumulation)
    assert jnp.allclose(out, ref, atol=2e-2, rtol=2e-2)

    # also exercise the original unbatched module signature
    out1 = similarity_linear_forward(sent1[0], sent2[0], prepared)
    out1 = jax.block_until_ready(out1)
    assert out1.shape == (5,)
    assert jnp.allclose(out1, ref[0], atol=2e-2, rtol=2e-2)

    print("KERNEL_OK")
</pallas_src>

<mosaic_0001>
module attributes {stable_mosaic.version = 11 : i64} {
  func.func @similarity_linear_kernel(%arg0: i32, %arg1: memref<8x32xf32, #tpu.memory_space<vmem>>, %arg2: memref<8x32xf32, #tpu.memory_space<vmem>>, %arg3: memref<128x128xbf16, #tpu.memory_space<vmem>>, %arg4: memref<1x128xf32, #tpu.memory_space<vmem>>, %arg5: memref<128x128xbf16, #tpu.memory_space<vmem>>, %arg6: memref<1x128xf32, #tpu.memory_space<vmem>>, %arg7: memref<8x128xf32, #tpu.memory_space<vmem>>) attributes {dimension_semantics = [#tpu.dimension_semantics<parallel>], iteration_bounds = array<i64: 1>, scalar_prefetch = 0 : i64, scratch_operands = 0 : i64, tpu.core_type = #tpu.core_type<tc>, window_params = [{transform_indices = @transform_0, window_bounds = array<i64: 8, 32>}, {transform_indices = @transform_1, window_bounds = array<i64: 8, 32>}, {pipeline_mode = #tpu.pipeline_mode<synchronous>, transform_indices = @transform_2, window_bounds = array<i64: 128, 128>}, {pipeline_mode = #tpu.pipeline_mode<synchronous>, transform_indices = @transform_3, window_bounds = array<i64: 1, 128>}, {pipeline_mode = #tpu.pipeline_mode<synchronous>, transform_indices = @transform_4, window_bounds = array<i64: 128, 128>}, {pipeline_mode = #tpu.pipeline_mode<synchronous>, transform_indices = @transform_5, window_bounds = array<i64: 1, 128>}, {transform_indices = @transform_6, window_bounds = array<i64: 8, 128>}]} {
    %c0 = arith.constant 0 : index
    %c0_0 = arith.constant 0 : index
    %0 = vector.load %arg1[%c0, %c0_0] : memref<8x32xf32, #tpu.memory_space<vmem>>, vector<8x32xf32>
    %c0_1 = arith.constant 0 : index
    %c0_2 = arith.constant 0 : index
    %1 = vector.load %arg2[%c0_1, %c0_2] : memref<8x32xf32, #tpu.memory_space<vmem>>, vector<8x32xf32>
    %2 = arith.mulf %0, %1 : vector<8x32xf32>
    %3 = arith.subf %0, %1 : vector<8x32xf32>
    %4 = math.absf %3 : vector<8x32xf32>
    %5 = tpu.concatenate %0, %1, %2, %4 in 1 : vector<8x32xf32>, vector<8x32xf32>, vector<8x32xf32>, vector<8x32xf32> -> vector<8x128xf32>
    %6 = arith.truncf %5 : vector<8x128xf32> to vector<8x128xbf16>
    %c0_3 = arith.constant 0 : index
    %c0_4 = arith.constant 0 : index
    %7 = vector.load %arg3[%c0_3, %c0_4] : memref<128x128xbf16, #tpu.memory_space<vmem>>, vector<128x128xbf16>
    %cst = arith.constant dense<0.000000e+00> : vector<8x128xf32>
    %8 = tpu.matmul %6, %7, %cst {dimension_numbers = #tpu.dot_dimension_numbers<[1], [0], [0], [1], [0, 0, 1, 1], [], []>} : vector<8x128xbf16>, vector<128x128xbf16>, vector<8x128xf32> -> vector<8x128xf32>
    %c0_5 = arith.constant 0 : index
    %c0_6 = arith.constant 0 : index
    %9 = vector.load %arg4[%c0_5, %c0_6] : memref<1x128xf32, #tpu.memory_space<vmem>>, vector<1x128xf32>
    %10 = vector.broadcast %9 : vector<1x128xf32> to vector<8x128xf32>
    %11 = arith.addf %8, %10 : vector<8x128xf32>
    %cst_7 = arith.constant 5.000000e-01 : f32
    %12 = vector.broadcast %cst_7 : f32 to vector<8x128xf32>
    %13 = arith.mulf %12, %11 : vector<8x128xf32>
    %14 = math.tanh %13 : vector<8x128xf32>
    %cst_8 = arith.constant 1.000000e+00 : f32
    %15 = vector.broadcast %cst_8 : f32 to vector<8x128xf32>
    %16 = arith.addf %14, %15 : vector<8x128xf32>
    %cst_9 = arith.constant 5.000000e-01 : f32
    %17 = vector.broadcast %cst_9 : f32 to vector<8x128xf32>
    %18 = arith.mulf %17, %16 : vector<8x128xf32>
    %19 = arith.truncf %18 : vector<8x128xf32> to vector<8x128xbf16>
    %c0_10 = arith.constant 0 : index
    %c0_11 = arith.constant 0 : index
    %20 = vector.load %arg5[%c0_10, %c0_11] : memref<128x128xbf16, #tpu.memory_space<vmem>>, vector<128x128xbf16>
    %cst_12 = arith.constant dense<0.000000e+00> : vector<8x128xf32>
    %21 = tpu.matmul %19, %20, %cst_12 {dimension_numbers = #tpu.dot_dimension_numbers<[1], [0], [0], [1], [0, 0, 1, 1], [], []>} : vector<8x128xbf16>, vector<128x128xbf16>, vector<8x128xf32> -> vector<8x128xf32>
    %c0_13 = arith.constant 0 : index
    %c0_14 = arith.constant 0 : index
    %22 = vector.load %arg6[%c0_13, %c0_14] : memref<1x128xf32, #tpu.memory_space<vmem>>, vector<1x128xf32>
    %23 = vector.broadcast %22 : vector<1x128xf32> to vector<8x128xf32>
    %24 = arith.addf %21, %23 : vector<8x128xf32>
    %cst_15 = arith.constant dense<0xFF800000> : vector<8xf32>
    %25 = vector.multi_reduction <maximumf>, %24, %cst_15 [1] : vector<8x128xf32> to vector<8xf32>
    %26 = vector.shape_cast %25 : vector<8xf32> to vector<8x1xf32>
    %27 = vector.broadcast %26 : vector<8x1xf32> to vector<8x128xf32>
    %28 = arith.subf %24, %27 : vector<8x128xf32>
    %29 = math.exp %28 : vector<8x128xf32>
    %cst_16 = arith.constant dense<0.000000e+00> : vector<8xf32>
    %30 = vector.multi_reduction <add>, %29, %cst_16 [1] : vector<8x128xf32> to vector<8xf32>
    %31 = vector.shape_cast %30 : vector<8xf32> to vector<8x1xf32>
    %32 = math.log %31 : vector<8x1xf32>
    %33 = vector.broadcast %32 : vector<8x1xf32> to vector<8x128xf32>
    %34 = arith.subf %28, %33 : vector<8x128xf32>
    %c0_17 = arith.constant 0 : index
    %c0_18 = arith.constant 0 : index
    %35 = vector.load %arg7[%c0_17, %c0_18] : memref<8x128xf32, #tpu.memory_space<vmem>>, vector<8x128xf32>
    tpu.vector_store %arg7[%c0_17, %c0_18], %34 {strides = array<i32>} : memref<8x128xf32, #tpu.memory_space<vmem>>, vector<8x128xf32>,
    return
  }
  func.func @transform_0(%arg0: i32) -> (i32, i32) {
    %c0_i32 = arith.constant 0 : i32
    %c0_i32_0 = arith.constant 0 : i32
    return %arg0, %c0_i32 : i32, i32
  }
  func.func @transform_1(%arg0: i32) -> (i32, i32) {
    %c0_i32 = arith.constant 0 : i32
    %c0_i32_0 = arith.constant 0 : i32
    return %arg0, %c0_i32 : i32, i32
  }
  func.func @transform_2(%arg0: i32) -> (i32, i32) {
    %c0_i32 = arith.constant 0 : i32
    %c0_i32_0 = arith.constant 0 : i32
    %c0_i32_1 = arith.constant 0 : i32
    return %c0_i32, %c0_i32_0 : i32, i32
  }
  func.func @transform_3(%arg0: i32) -> (i32, i32) {
    %c0_i32 = arith.constant 0 : i32
    %c0_i32_0 = arith.constant 0 : i32
    %c0_i32_1 = arith.constant 0 : i32
    return %c0_i32, %c0_i32_0 : i32, i32
  }
  func.func @transform_4(%arg0: i32) -> (i32, i32) {
    %c0_i32 = arith.constant 0 : i32
    %c0_i32_0 = arith.constant 0 : i32
    %c0_i32_1 = arith.constant 0 : i32
    return %c0_i32, %c0_i32_0 : i32, i32
  }
  func.func @transform_5(%arg0: i32) -> (i32, i32) {
    %c0_i32 = arith.constant 0 : i32
    %c0_i32_0 = arith.constant 0 : i32
    %c0_i32_1 = arith.constant 0 : i32
    return %c0_i32, %c0_i32_0 : i32, i32
  }
  func.func @transform_6(%arg0: i32) -> (i32, i32) {
    %c0_i32 = arith.constant 0 : i32
    %c0_i32_0 = arith.constant 0 : i32
    return %arg0, %c0_i32 : i32, i32
  }
}

module attributes {stable_mosaic.version = 11 : i64} {
  func.func @similarity_linear_kernel(%arg0: i32, %arg1: memref<8x32xf32, #tpu.memory_space<vmem>>, %arg2: memref<8x32xf32, #tpu.memory_space<vmem>>, %arg3: memref<128x128xbf16, #tpu.memory_space<vmem>>, %arg4: memref<1x128xf32, #tpu.memory_space<vmem>>, %arg5: memref<128x128xbf16, #tpu.memory_space<vmem>>, %arg6: memref<1x128xf32, #tpu.memory_space<vmem>>, %arg7: memref<8x128xf32, #tpu.memory_space<vmem>>) attributes {dimension_semantics = [#tpu.dimension_semantics<parallel>], iteration_bounds = array<i64: 1>, scalar_prefetch = 0 : i64, scratch_operands = 0 : i64, tpu.core_type = #tpu.core_type<tc>, window_params = [{transform_indices = @transform_0, window_bounds = array<i64: 8, 32>}, {transform_indices = @transform_1, window_bounds = array<i64: 8, 32>}, {pipeline_mode = #tpu.pipeline_mode<synchronous>, transform_indices = @transform_2, window_bounds = array<i64: 128, 128>}, {pipeline_mode = #tpu.pipeline_mode<synchronous>, transform_indices = @transform_3, window_bounds = array<i64: 1, 128>}, {pipeline_mode = #tpu.pipeline_mode<synchronous>, transform_indices = @transform_4, window_bounds = array<i64: 128, 128>}, {pipeline_mode = #tpu.pipeline_mode<synchronous>, transform_indices = @transform_5, window_bounds = array<i64: 1, 128>}, {transform_indices = @transform_6, window_bounds = array<i64: 8, 128>}]} {
    %c0 = arith.constant 0 : index
    %c0_0 = arith.constant 0 : index
    %0 = vector.load %arg1[%c0, %c0_0] : memref<8x32xf32, #tpu.memory_space<vmem>>, vector<8x32xf32>
    %c0_1 = arith.constant 0 : index
    %c0_2 = arith.constant 0 : index
    %1 = vector.load %arg2[%c0_1, %c0_2] : memref<8x32xf32, #tpu.memory_space<vmem>>, vector<8x32xf32>
    %2 = arith.mulf %0, %1 : vector<8x32xf32>
    %3 = arith.subf %0, %1 : vector<8x32xf32>
    %4 = math.absf %3 : vector<8x32xf32>
    %5 = tpu.concatenate %0, %1, %2, %4 in 1 : vector<8x32xf32>, vector<8x32xf32>, vector<8x32xf32>, vector<8x32xf32> -> vector<8x128xf32>
    %6 = arith.truncf %5 : vector<8x128xf32> to vector<8x128xbf16>
    %c0_3 = arith.constant 0 : index
    %c0_4 = arith.constant 0 : index
    %7 = vector.load %arg3[%c0_3, %c0_4] : memref<128x128xbf16, #tpu.memory_space<vmem>>, vector<128x128xbf16>
    %cst = arith.constant dense<0.000000e+00> : vector<8x128xf32>
    %8 = tpu.matmul %6, %7, %cst {dimension_numbers = #tpu.dot_dimension_numbers<[1], [0], [0], [1], [0, 0, 1, 1], [], []>} : vector<8x128xbf16>, vector<128x128xbf16>, vector<8x128xf32> -> vector<8x128xf32>
    %c0_5 = arith.constant 0 : index
    %c0_6 = arith.constant 0 : index
    %9 = vector.load %arg4[%c0_5, %c0_6] : memref<1x128xf32, #tpu.memory_space<vmem>>, vector<1x128xf32>
    %10 = vector.broadcast %9 : vector<1x128xf32> to vector<8x128xf32>
    %11 = arith.addf %8, %10 : vector<8x128xf32>
    %cst_7 = arith.constant 5.000000e-01 : f32
    %12 = vector.broadcast %cst_7 : f32 to vector<8x128xf32>
    %13 = arith.mulf %12, %11 : vector<8x128xf32>
    %14 = math.tanh %13 : vector<8x128xf32>
    %cst_8 = arith.constant 1.000000e+00 : f32
    %15 = vector.broadcast %cst_8 : f32 to vector<8x128xf32>
    %16 = arith.addf %14, %15 : vector<8x128xf32>
    %cst_9 = arith.constant 5.000000e-01 : f32
    %17 = vector.broadcast %cst_9 : f32 to vector<8x128xf32>
    %18 = arith.mulf %17, %16 : vector<8x128xf32>
    %19 = arith.truncf %18 : vector<8x128xf32> to vector<8x128xbf16>
    %c0_10 = arith.constant 0 : index
    %c0_11 = arith.constant 0 : index
    %20 = vector.load %arg5[%c0_10, %c0_11] : memref<128x128xbf16, #tpu.memory_space<vmem>>, vector<128x128xbf16>
    %cst_12 = arith.constant dense<0.000000e+00> : vector<8x128xf32>
    %21 = tpu.matmul %19, %20, %cst_12 {dimension_numbers = #tpu.dot_dimension_numbers<[1], [0], [0], [1], [0, 0, 1, 1], [], []>} : vector<8x128xbf16>, vector<128x128xbf16>, vector<8x128xf32> -> vector<8x128xf32>
    %c0_13 = arith.constant 0 : index
    %c0_14 = arith.constant 0 : index
    %22 = vector.load %arg6[%c0_13, %c0_14] : memref<1x128xf32, #tpu.memory_space<vmem>>, vector<1x128xf32>
    %23 = vector.broadcast %22 : vector<1x128xf32> to vector<8x128xf32>
    %24 = arith.addf %21, %23 : vector<8x128xf32>
    %cst_15 = arith.constant dense<0xFF800000> : vector<8xf32>
    %25 = vector.multi_reduction <maximumf>, %24, %cst_15 [1] : vector<8x128xf32> to vector<8xf32>
    %26 = vector.shape_cast %25 : vector<8xf32> to vector<8x1xf32>
    %27 = vector.broadcast %26 : vector<8x1xf32> to vector<8x128xf32>
    %28 = arith.subf %24, %27 : vector<8x128xf32>
    %29 = math.exp %28 : vector<8x128xf32>
    %cst_16 = arith.constant dense<0.000000e+00> : vector<8xf32>
    %30 = vector.multi_reduction <add>, %29, %cst_16 [1] : vector<8x128xf32> to vector<8xf32>
    %31 = vector.shape_cast %30 : vector<8xf32> to vector<8x1xf32>
    %32 = math.log %31 : vector<8x1xf32>
    %33 = vector.broadcast %32 : vector<8x1xf32> to vector<8x128xf32>
    %34 = arith.subf %28, %33 : vector<8x128xf32>
    %c0_17 = arith.constant 0 : index
    %c0_18 = arith.constant 0 : index
    %35 = vector.load %arg7[%c0_17, %c0_18] : memref<8x128xf32, #tpu.memory_space<vmem>>, vector<8x128xf32>
    tpu.vector_store %arg7[%c0_17, %c0_18], %34 {strides = array<i32>} : memref<8x128xf32, #tpu.memory_space<vmem>>, vector<8x128xf32>,
    return
  }
  func.func @transform_0(%arg0: i32) -> (i32, i32) {
    %c0_i32 = arith.constant 0 : i32
    %c0_i32_0 = arith.constant 0 : i32
    return %arg0, %c0_i32 : i32, i32
  }
  func.func @transform_1(%arg0: i32) -> (i32, i32) {
    %c0_i32 = arith.constant 0 : i32
    %c0_i32_0 = arith.constant 0 : i32
    return %arg0, %c0_i32 : i32, i32
  }
  func.func @transform_2(%arg0: i32) -> (i32, i32) {
    %c0_i32 = arith.constant 0 : i32
    %c0_i32_0 = arith.constant 0 : i32
    %c0_i32_1 = arith.constant 0 : i32
    return %c0_i32, %c0_i32_0 : i32, i32
  }
  func.func @transform_3(%arg0: i32) -> (i32, i32) {
    %c0_i32 = arith.constant 0 : i32
    %c0_i32_0 = arith.constant 0 : i32
    %c0_i32_1 = arith.constant 0 : i32
    return %c0_i32, %c0_i32_0 : i32, i32
  }
  func.func @transform_4(%arg0: i32) -> (i32, i32) {
    %c0_i32 = arith.constant 0 : i32
    %c0_i32_0 = arith.constant 0 : i32
    %c0_i32_1 = arith.constant 0 : i32
    return %c0_i32, %c0_i32_0 : i32, i32
  }
  func.func @transform_5(%arg0: i32) -> (i32, i32) {
    %c0_i32 = arith.constant 0 : i32
    %c0_i32_0 = arith.constant 0 : i32
    %c0_i32_1 = arith.constant 0 : i32
    return %c0_i32, %c0_i32_0 : i32, i32
  }
  func.func @transform_6(%arg0: i32) -> (i32, i32) {
    %c0_i32 = arith.constant 0 : i32
    %c0_i32_0 = arith.constant 0 : i32
    return %arg0, %c0_i32 : i32, i32
  }
}

</mosaic_0001>

<bundles_post_ra>
// kernel: tpu_custom_call.1
= control target key start
LH: loop header
LB: loop body
LE: loop exit
PB: predicated region body
PF: predicated region fallthrough
CT: control target
= control target key end

     0   :  { %11 = vsyncpa [#allocation3], 0  ;;  %s662_s0 = inlined_call_operand.hbm [shape: f32[8,32], index: 0, kind: input, shape index: {}]   ;;  %s663_s1 = inlined_call_operand.hbm [shape: f32[8,32], index: 1, kind: input, shape index: {}]   ;;  %s664_s2 = inlined_call_operand.hbm [shape: bf16[128,128], index: 2, kind: input, shape index: {}]   ;;  %s665_s3 = inlined_call_operand.vmem [shape: f32[1,128], index: 3, kind: input, shape index: {}]   ;;  %s666_s4 = inlined_call_operand.hbm [shape: bf16[128,128], index: 4, kind: input, shape index: {}]   ;;  %s667_s5 = inlined_call_operand.vmem [shape: f32[1,128], index: 5, kind: input, shape index: {}]   ;;  %s668_s6 = inlined_call_operand.hbm [shape: f32[8,128], index: 6, kind: output, shape index: {}]  }
   0x1   :  { %12 = vsyncpa [#allocation6], 0 }
   0x2   :  { %13 = vsyncpa [#allocation9], 0 }
   0x3   :  { %14 = vsyncpa [#allocation4], 0  ;;  %s572_s21 = smov [#allocation5]   ;;  %s573_s23 = smov [#allocation2]  }
   0x4   :  { %s31_s22 = sshll.u32 %s572_s21, 4  ;;  %s21_s24 = sshll.u32 %s573_s23, 4  ;;  %s32_s22 = int_to_ptr.vmem [resolvable:$true] %s31_s22  ;;  %s22_s24 = int_to_ptr.vmem [resolvable:$true] %s21_s24 }
   0x5   :  { %s472_s25 = scalar_lea.vmem %s32_s22, 128  ;;  %p477_p1 = scmp.lt.s32.totalorder %s32_s22, %s32_s22 }
   0x6   :  { %p473_p0 = scmp.ne.s32.totalorder %s32_s22, %s472_s25  ;;  %p478_p2 = scmp.lt.s32.totalorder %s472_s25, %s472_s25 }
   0x8   :  { %p479_p3 = por %p478_p2, %p477_p1 }
   0xa   :  { %p480_p4 = pnand %p479_p3, %p473_p0 }
   0xc   :  { %483 = shalt.err (!%p480_p4)
}
   0xd   :  { %34 = dma.hbm_to_vmem [thread:$0]  %s663_s1, 128, %s32_s22, [#allocation6]  }
   0xe   :  { %s492_s28 = scalar_lea.vmem %s22_s24, 128  ;;  %p497_p6 = scmp.lt.s32.totalorder %s22_s24, %s22_s24 }
   0xf   :  { %p493_p5 = scmp.ne.s32.totalorder %s22_s24, %s492_s28  ;;  %p498_p7 = scmp.lt.s32.totalorder %s492_s28, %s492_s28 }
  0x11   :  { %p499_p8 = por %p498_p7, %p497_p6 }
  0x13   :  { %p500_p9 = pnand %p499_p8, %p493_p5 }
  0x15   :  { %503 = shalt.err (!%p500_p9)
}
  0x16   :  { %24 = dma.hbm_to_vmem [thread:$0]  %s662_s0, 128, %s22_s24, [#allocation3]  }
  0x17   :  { %s574_s7 = smov [#allocation7]  }
  0x18   :  { %s40_s8 = sshll.u32 %s574_s7, 4  ;;  %s41_s8 = int_to_ptr.vmem [resolvable:$true] %s40_s8 }
  0x19   :  { %s512_s9 = scalar_lea.vmem %s41_s8, 1024  ;;  %p517_p11 = scmp.lt.s32.totalorder %s41_s8, %s41_s8 }
  0x1a   :  { %p513_p10 = scmp.ne.s32.totalorder %s41_s8, %s512_s9  ;;  %p518_p12 = scmp.lt.s32.totalorder %s512_s9, %s512_s9 }
  0x1c   :  { %p519_p13 = por %p518_p12, %p517_p11 }
  0x1e   :  { %p520_p0 = pnand %p519_p13, %p513_p10 }
  0x20   :  { %523 = shalt.err (!%p520_p0)
}
  0x21   :  { %s575_s1 = smov 64   ;;  %s576_s10 = smov 4  }
  0x22   :  { %46 = dma.hbm_to_vmem [thread:$0]  %s664_s2, 1024, %s41_s8, [#allocation6], %s575_s1, %s575_s1, %s576_s10  }
  0x23   :  { %s577_s13 = smov [#allocation8]  }
  0x24   :  { %s54_s0 = sshll.u32 %s577_s13, 4  ;;  %s55_s0 = int_to_ptr.vmem [resolvable:$true] %s54_s0 }
  0x25   :  { %s532_s14 = scalar_lea.vmem %s55_s0, 1024  ;;  %p537_p2 = scmp.lt.s32.totalorder %s55_s0, %s55_s0 }
  0x26   :  { %p533_p1 = scmp.ne.s32.totalorder %s55_s0, %s532_s14  ;;  %p538_p3 = scmp.lt.s32.totalorder %s532_s14, %s532_s14 }
  0x28   :  { %p539_p4 = por %p538_p3, %p537_p2 }
  0x2a   :  { %p540_p5 = pnand %p539_p4, %p533_p1 }
  0x2c   :  { %543 = shalt.err (!%p540_p5)
}
  0x2d   :  { %60 = dma.hbm_to_vmem [thread:$0]  %s666_s4, 1024, %s55_s0, [#allocation9], %s575_s1, %s575_s1, %s576_s10  }
  0x2e   :  { %564 = dma.done.wait [#allocation3], 128  }
  0x2f   :  { %565 = vsyncadd [#allocation3], 4294967168 }
  0x30   :  { %566 = dma.done.wait [#allocation6], 1152  }
  0x31   :  { %567 = vsyncadd [#allocation6], 4294966144 }
  0x32   :  { %568 = dma.done.wait [#allocation9], 1024  }
  0x33   :  { %569 = vsyncadd [#allocation9], 4294966272  ;;  %v578_v0 = vmov 0.0   ;;  %vm579_vm0 = vmmov 0   ;;  %v77_v1 = vld [vmem:[#allocation5] sm:$0xff]  ;;  %v76_v2 = vld [vmem:[#allocation2] sm:$0xff] }
  0x34   :  { %391 = vmatprep.subr.bf16.mxu0 %v578_v0  ;;  %411 = vmatprep.subr.bf16.mxu1 %v578_v0  ;;  %s580_s2 = smov 32   ;;  %v78_v3 = vmul.f32 %v77_v1, %v76_v2  ;;  %v79_v4 = vsub.f32 %v76_v2, %v77_v1  ;;  %v442_v5 = vld [vmem:[#allocation7 + $0x38] sm:$0xff]   ;;  %v443_v7 = vld [vmem:[#allocation7 + $0x30] sm:$0xff]   ;;  %s581_s4 = smov 96   ;;  %v444_v8 = vld [vmem:[#allocation7 + $0x28] sm:$0xff]   ;;  %vm93_vm1 = vcmask 261120  }
  0x35   :  { %407 = vmatprep.mubr.msk.bf16.mxu0 %vm579_vm0, %v578_v0  ;;  %427 = vmatprep.mubr.msk.bf16.mxu1 %vm579_vm0, %v578_v0  ;;  %v450_v9 = vld [vmem:[#allocation8 + $0x38] sm:$0xff]   ;;  %v445_v10 = vld [vmem:[#allocation7 + $0x20] sm:$0xff]   ;;  %v451_v11 = vld [vmem:[#allocation8 + $0x30] sm:$0xff]   ;;  %vm95_vm2 = vcmask 523264   ;;  %vm97_vm3 = vcmask 785408  }
  0x36   :  { %82 = vrot.lane.b32.xlu0 %v77_v1, %s580_s2  ;;  %v80_v6 = vand.u32 2147483647, %v79_v4  ;;  %392 = vmatpush3.bf16.msra.mxu0 %v442_v5  ;;  %v446_v12 = vld [vmem:[#allocation7 + $0x18] sm:$0xff]   ;;  %v447_v13 = vld [vmem:[#allocation7 + $0x10] sm:$0xff]   ;;  %v448_v14 = vld [vmem:[#allocation7 + $0x8] sm:$0xff]  }
  0x37   :  { %393 = vmatprep.subr.bf16.mxu0 %v578_v0  ;;  %412 = vmatpush3.bf16.msra.mxu1 %v450_v9  ;;  %v449_v15 = vld [vmem:[#allocation7] sm:$0xff]   ;;  %v452_v23 = vld [vmem:[#allocation8 + $0x28] sm:$0xff]   ;;  %v454_v25 = vld [vmem:[#allocation8 + $0x18] sm:$0xff]  }
  0x38   :  { %90 = vrot.lane.b32.xlu1 %v80_v6, %s581_s4  ;;  %413 = vmatprep.subr.bf16.mxu1 %v578_v0  ;;  %v453_v24 = vld [vmem:[#allocation8 + $0x20] sm:$0xff]   ;;  %v455_v26 = vld [vmem:[#allocation8 + $0x10] sm:$0xff]   ;;  %v456_v27 = vld [vmem:[#allocation8 + $0x8] sm:$0xff]  }
  0x39   :  { %v457_v28 = vld [vmem:[#allocation8] sm:$0xff]   ;;  %v355_v29 = vld [vmem:[%s665_s3] ss:$0 sm:$0xff]  ;;  %s582_s3 = smov [#allocation10]  }
  0x3a   :  { %86 = vrot.lane.b32.xlu0 %v78_v3, %s575_s1  ;;  %394 = vmatpush3.bf16.msra.mxu0 %v443_v7  ;;  %v364_v40 = vld [vmem:[%s667_s5] ss:$0 sm:$0xff]  ;;  %s344_s21 = sshll.u32 %s582_s3, 4  ;;  %s345_s21 = int_to_ptr.vmem [resolvable:$true] %s344_s21 }
  0x3b   :  { %395 = vmatprep.subr.bf16.mxu0 %v578_v0  ;;  %414 = vmatpush3.bf16.msra.mxu1 %v451_v11  ;;  %s544_s5 = scalar_lea.vmem %s345_s21, 128  ;;  %p549_p7 = scmp.lt.s32.totalorder %s345_s21, %s345_s21 }
  0x3c   :  { %415 = vmatprep.subr.bf16.mxu1 %v578_v0  ;;  %p545_p6 = scmp.ne.s32.totalorder %s345_s21, %s544_s5  ;;  %p550_p8 = scmp.lt.s32.totalorder %s544_s5, %s544_s5 }
  0x3e   :  { %396 = vmatpush3.bf16.msra.mxu0 %v444_v8  ;;  %p551_p9 = por %p550_p8, %p549_p7 }
  0x3f   :  { %397 = vmatprep.subr.bf16.mxu0 %v578_v0  ;;  %416 = vmatpush3.bf16.msra.mxu1 %v452_v23 }
  0x40   :  { %417 = vmatprep.subr.bf16.mxu1 %v578_v0  ;;  %p552_p10 = pnand %p551_p9, %p545_p6 }
  0x42   :  { %398 = vmatpush3.bf16.msra.mxu0 %v445_v10 }
  0x43   :  { %399 = vmatprep.subr.bf16.mxu0 %v578_v0  ;;  %418 = vmatpush3.bf16.msra.mxu1 %v453_v24 }
  0x44   :  { %419 = vmatprep.subr.bf16.mxu1 %v578_v0 }
  0x46   :  { %400 = vmatpush3.bf16.msra.mxu0 %v446_v12 }
  0x47   :  { %401 = vmatprep.subr.bf16.mxu0 %v578_v0  ;;  %420 = vmatpush3.bf16.msra.mxu1 %v454_v25 }
  0x48   :  { %421 = vmatprep.subr.bf16.mxu1 %v578_v0 }
  0x4a   :  { %402 = vmatpush3.bf16.msra.mxu0 %v447_v13 }
  0x4b   :  { %403 = vmatprep.subr.bf16.mxu0 %v578_v0  ;;  %422 = vmatpush3.bf16.msra.mxu1 %v455_v26 }
  0x4c   :  { %423 = vmatprep.subr.bf16.mxu1 %v578_v0 }
  0x4e   :  { %404 = vmatpush3.bf16.msra.mxu0 %v448_v14 }
  0x4f   :  { %405 = vmatprep.subr.bf16.mxu0 %v578_v0  ;;  %424 = vmatpush3.bf16.msra.mxu1 %v456_v27 }
  0x50   :  { %425 = vmatprep.subr.bf16.mxu1 %v578_v0 }
  0x52   :  { %406 = vmatpush3.bf16.msra.mxu0 %v449_v15 }
  0x53   :  { %426 = vmatpush3.bf16.msra.mxu1 %v457_v28 }
  0xa8   :  { %v83_v16 = vpop.permute.xlu0 %82 }
  0xa9   :  { %v94_v17 = vsel %vm93_vm1, %v76_v2, %v83_v16 }
  0xaa   :  { %v91_v19 = vpop.permute.xlu1 %90 }
  0xac   :  { %v87_v18 = vpop.permute.xlu0 %86 }
  0xad   :  { %v96_v20 = vsel %vm95_vm2, %v94_v17, %v87_v18 }
  0xae   :  { %v98_v21 = vsel %vm97_vm3, %v96_v20, %v91_v19 }
  0xaf   :  { %v99_v22 = vpack.c.bf16 %v98_v21, %v98_v21 }
  0xb1   :  { %408 = vmatmul.mubr.bf16.vlgmr.msra.gmra.mxu0 %v99_v22 }
 0x171   :  { %v205_v30 = vpop.f32.mrf.mxu0 }
 0x172   :  { %v206_v31 = vadd.f32 %v355_v29, %v205_v30 }
 0x173   :  { %v409_v32 = vpop.f32.mrf.mxu0 }
 0x174   :  { %v211_v33 = vmul.f32 0.5, %v206_v31 }
 0x175   :  { %v208_v34 = vpop.f32.mrf.mxu0 }
 0x176   :  { %458 = vtanh.f32 %v211_v33 }
 0x177   :  { %v410_v35 = vpop.f32.mrf.mxu0 }
 0x183   :  { %v459_v36 = vpop.eup %458 }
 0x184   :  { %v213_v37 = vadd.f32 1.0, %v459_v36 }
 0x186   :  { %v214_v38 = vmul.f32 0.5, %v213_v37 }
 0x188   :  { %v215_v39 = vpack.c.bf16 %v214_v38, %v214_v38 }
 0x18a   :  { %428 = vmatmul.mubr.bf16.vlgmr.msra.gmra.mxu1 %v215_v39 }
 0x24a   :  { %v321_v41 = vpop.f32.mrf.mxu1 }
 0x24b   :  { %v322_v42 = vadd.f32 %v364_v40, %v321_v41 }
 0x24c   :  { %v429_v43 = vpop.f32.mrf.mxu1 }
 0x24d   :  { %327 = vmax.xlane.f32.xlu1 %v322_v42 }
 0x24e   :  { %v324_v44 = vpop.f32.mrf.mxu1 }
 0x250   :  { %v430_v45 = vpop.f32.mrf.mxu1 }
 0x2d6   :  { %v328_v46 = vpop.xlane.xlu1 %327 }
 0x2d7   :  { %v329_v47 = vsub.f32 %v322_v42, %v328_v46 }
 0x2d9   :  { %v330_v48 = vmul.f32 1.442695, %v329_v47 }
 0x2db   :  { %460 = vpow2.f32 %v330_v48 }
 0x2e8   :  { %v461_v49 = vpop.eup %460 }
 0x2e9   :  { %332 = vadd.xlane.f32.xlu0 %v461_v49 }
 0x372   :  { %v333_v50 = vpop.xlane.xlu0 %332 }
 0x373   :  { %462 = vlog2.f32 %v333_v50 }
 0x380   :  { %v463_v51 = vpop.eup %462 }
 0x381   :  { %v335_v52 = vmul.f32 0.6931472, %v463_v51 }
 0x383   :  { %v336_v53 = vsub.f32 %v329_v47, %v335_v52 }
 0x385   :  { %337 = vst [vmem:[#allocation10] sm:$0xff] %v336_v53 }
 0x386   :  { %555 = shalt.err (!%p552_p10)
}
 0x387   :  { %347 = dma.vmem_to_hbm [thread:$0]  %s345_s21, 128, %s668_s6, [#allocation4]  }
 0x388   :  { %570 = dma.done.wait [#allocation4], 128  }
 0x389   :  { %571 = vsyncadd [#allocation4], 4294967168 }
 0x38a   :  { %351 = vsyncpa [#allocation3], 1 }
 0x38b   :  { %352 = vsyncpa [#allocation6], 1 }
 0x38c   :  { %353 = vsyncpa [#allocation9], 1 }
 0x38d   :  { %354 = vsyncpa [#allocation4], 1 }

// kernel: tpu_custom_call.1
= control target key start
LH: loop header
LB: loop body
LE: loop exit
PB: predicated region body
PF: predicated region fallthrough
CT: control target
= control target key end

     0   :  { %11 = vsyncpa [#allocation3], 0  ;;  %s662_s0 = inlined_call_operand.hbm [shape: f32[8,32], index: 0, kind: input, shape index: {}]   ;;  %s663_s1 = inlined_call_operand.hbm [shape: f32[8,32], index: 1, kind: input, shape index: {}]   ;;  %s664_s2 = inlined_call_operand.hbm [shape: bf16[128,128], index: 2, kind: input, shape index: {}]   ;;  %s665_s3 = inlined_call_operand.vmem [shape: f32[1,128], index: 3, kind: input, shape index: {}]   ;;  %s666_s4 = inlined_call_operand.hbm [shape: bf16[128,128], index: 4, kind: input, shape index: {}]   ;;  %s667_s5 = inlined_call_operand.vmem [shape: f32[1,128], index: 5, kind: input, shape index: {}]   ;;  %s668_s6 = inlined_call_operand.hbm [shape: f32[8,128], index: 6, kind: output, shape index: {}]  }
   0x1   :  { %12 = vsyncpa [#allocation6], 0 }
   0x2   :  { %13 = vsyncpa [#allocation9], 0 }
   0x3   :  { %14 = vsyncpa [#allocation4], 0  ;;  %s572_s21 = smov [#allocation5]   ;;  %s573_s23 = smov [#allocation2]  }
   0x4   :  { %s31_s22 = sshll.u32 %s572_s21, 4  ;;  %s21_s24 = sshll.u32 %s573_s23, 4  ;;  %s32_s22 = int_to_ptr.vmem [resolvable:$true] %s31_s22  ;;  %s22_s24 = int_to_ptr.vmem [resolvable:$true] %s21_s24 }
   0x5   :  { %s472_s25 = scalar_lea.vmem %s32_s22, 128  ;;  %p477_p1 = scmp.lt.s32.totalorder %s32_s22, %s32_s22 }
   0x6   :  { %p473_p0 = scmp.ne.s32.totalorder %s32_s22, %s472_s25  ;;  %p478_p2 = scmp.lt.s32.totalorder %s472_s25, %s472_s25 }
   0x8   :  { %p479_p3 = por %p478_p2, %p477_p1 }
   0xa   :  { %p480_p4 = pnand %p479_p3, %p473_p0 }
   0xc   :  { %483 = shalt.err (!%p480_p4)
}
   0xd   :  { %34 = dma.hbm_to_vmem [thread:$0]  %s663_s1, 128, %s32_s22, [#allocation6]  }
   0xe   :  { %s492_s28 = scalar_lea.vmem %s22_s24, 128  ;;  %p497_p6 = scmp.lt.s32.totalorder %s22_s24, %s22_s24 }
   0xf   :  { %p493_p5 = scmp.ne.s32.totalorder %s22_s24, %s492_s28  ;;  %p498_p7 = scmp.lt.s32.totalorder %s492_s28, %s492_s28 }
  0x11   :  { %p499_p8 = por %p498_p7, %p497_p6 }
  0x13   :  { %p500_p9 = pnand %p499_p8, %p493_p5 }
  0x15   :  { %503 = shalt.err (!%p500_p9)
}
  0x16   :  { %24 = dma.hbm_to_vmem [thread:$0]  %s662_s0, 128, %s22_s24, [#allocation3]  }
  0x17   :  { %s574_s7 = smov [#allocation7]  }
  0x18   :  { %s40_s8 = sshll.u32 %s574_s7, 4  ;;  %s41_s8 = int_to_ptr.vmem [resolvable:$true] %s40_s8 }
  0x19   :  { %s512_s9 = scalar_lea.vmem %s41_s8, 1024  ;;  %p517_p11 = scmp.lt.s32.totalorder %s41_s8, %s41_s8 }
  0x1a   :  { %p513_p10 = scmp.ne.s32.totalorder %s41_s8, %s512_s9  ;;  %p518_p12 = scmp.lt.s32.totalorder %s512_s9, %s512_s9 }
  0x1c   :  { %p519_p13 = por %p518_p12, %p517_p11 }
  0x1e   :  { %p520_p0 = pnand %p519_p13, %p513_p10 }
  0x20   :  { %523 = shalt.err (!%p520_p0)
}
  0x21   :  { %s575_s1 = smov 64   ;;  %s576_s10 = smov 4  }
  0x22   :  { %46 = dma.hbm_to_vmem [thread:$0]  %s664_s2, 1024, %s41_s8, [#allocation6], %s575_s1, %s575_s1, %s576_s10  }
  0x23   :  { %s577_s13 = smov [#allocation8]  }
  0x24   :  { %s54_s0 = sshll.u32 %s577_s13, 4  ;;  %s55_s0 = int_to_ptr.vmem [resolvable:$true] %s54_s0 }
  0x25   :  { %s532_s14 = scalar_lea.vmem %s55_s0, 1024  ;;  %p537_p2 = scmp.lt.s32.totalorder %s55_s0, %s55_s0 }
  0x26   :  { %p533_p1 = scmp.ne.s32.totalorder %s55_s0, %s532_s14  ;;  %p538_p3 = scmp.lt.s32.totalorder %s532_s14, %s532_s14 }
  0x28   :  { %p539_p4 = por %p538_p3, %p537_p2 }
  0x2a   :  { %p540_p5 = pnand %p539_p4, %p533_p1 }
  0x2c   :  { %543 = shalt.err (!%p540_p5)
}
  0x2d   :  { %60 = dma.hbm_to_vmem [thread:$0]  %s666_s4, 1024, %s55_s0, [#allocation9], %s575_s1, %s575_s1, %s576_s10  }
  0x2e   :  { %564 = dma.done.wait [#allocation3], 128  }
  0x2f   :  { %565 = vsyncadd [#allocation3], 4294967168 }
  0x30   :  { %566 = dma.done.wait [#allocation6], 1152  }
  0x31   :  { %567 = vsyncadd [#allocation6], 4294966144 }
  0x32   :  { %568 = dma.done.wait [#allocation9], 1024  }
  0x33   :  { %569 = vsyncadd [#allocation9], 4294966272  ;;  %v578_v0 = vmov 0.0   ;;  %vm579_vm0 = vmmov 0   ;;  %v77_v1 = vld [vmem:[#allocation5] sm:$0xff]  ;;  %v76_v2 = vld [vmem:[#allocation2] sm:$0xff] }
  0x34   :  { %391 = vmatprep.subr.bf16.mxu0 %v578_v0  ;;  %411 = vmatprep.subr.bf16.mxu1 %v578_v0  ;;  %s580_s2 = smov 32   ;;  %v78_v3 = vmul.f32 %v77_v1, %v76_v2  ;;  %v79_v4 = vsub.f32 %v76_v2, %v77_v1  ;;  %v442_v5 = vld [vmem:[#allocation7 + $0x38] sm:$0xff]   ;;  %v443_v7 = vld [vmem:[#allocation7 + $0x30] sm:$0xff]   ;;  %s581_s4 = smov 96   ;;  %v444_v8 = vld [vmem:[#allocation7 + $0x28] sm:$0xff]   ;;  %vm93_vm1 = vcmask 261120  }
  0x35   :  { %407 = vmatprep.mubr.msk.bf16.mxu0 %vm579_vm0, %v578_v0  ;;  %427 = vmatprep.mubr.msk.bf16.mxu1 %vm579_vm0, %v578_v0  ;;  %v450_v9 = vld [vmem:[#allocation8 + $0x38] sm:$0xff]   ;;  %v445_v10 = vld [vmem:[#allocation7 + $0x20] sm:$0xff]   ;;  %v451_v11 = vld [vmem:[#allocation8 + $0x30] sm:$0xff]   ;;  %vm95_vm2 = vcmask 523264   ;;  %vm97_vm3 = vcmask 785408  }
  0x36   :  { %82 = vrot.lane.b32.xlu0 %v77_v1, %s580_s2  ;;  %v80_v6 = vand.u32 2147483647, %v79_v4  ;;  %392 = vmatpush3.bf16.msra.mxu0 %v442_v5  ;;  %v446_v12 = vld [vmem:[#allocation7 + $0x18] sm:$0xff]   ;;  %v447_v13 = vld [vmem:[#allocation7 + $0x10] sm:$0xff]   ;;  %v448_v14 = vld [vmem:[#allocation7 + $0x8] sm:$0xff]  }
  0x37   :  { %393 = vmatprep.subr.bf16.mxu0 %v578_v0  ;;  %412 = vmatpush3.bf16.msra.mxu1 %v450_v9  ;;  %v449_v15 = vld [vmem:[#allocation7] sm:$0xff]   ;;  %v452_v23 = vld [vmem:[#allocation8 + $0x28] sm:$0xff]   ;;  %v454_v25 = vld [vmem:[#allocation8 + $0x18] sm:$0xff]  }
  0x38   :  { %90 = vrot.lane.b32.xlu1 %v80_v6, %s581_s4  ;;  %413 = vmatprep.subr.bf16.mxu1 %v578_v0  ;;  %v453_v24 = vld [vmem:[#allocation8 + $0x20] sm:$0xff]   ;;  %v455_v26 = vld [vmem:[#allocation8 + $0x10] sm:$0xff]   ;;  %v456_v27 = vld [vmem:[#allocation8 + $0x8] sm:$0xff]  }
  0x39   :  { %v457_v28 = vld [vmem:[#allocation8] sm:$0xff]   ;;  %v355_v29 = vld [vmem:[%s665_s3] ss:$0 sm:$0xff]  ;;  %s582_s3 = smov [#allocation10]  }
  0x3a   :  { %86 = vrot.lane.b32.xlu0 %v78_v3, %s575_s1  ;;  %394 = vmatpush3.bf16.msra.mxu0 %v443_v7  ;;  %v364_v40 = vld [vmem:[%s667_s5] ss:$0 sm:$0xff]  ;;  %s344_s21 = sshll.u32 %s582_s3, 4  ;;  %s345_s21 = int_to_ptr.vmem [resolvable:$true] %s344_s21 }
  0x3b   :  { %395 = vmatprep.subr.bf16.mxu0 %v578_v0  ;;  %414 = vmatpush3.bf16.msra.mxu1 %v451_v11  ;;  %s544_s5 = scalar_lea.vmem %s345_s21, 128  ;;  %p549_p7 = scmp.lt.s32.totalorder %s345_s21, %s345_s21 }
  0x3c   :  { %415 = vmatprep.subr.bf16.mxu1 %v578_v0  ;;  %p545_p6 = scmp.ne.s32.totalorder %s345_s21, %s544_s5  ;;  %p550_p8 = scmp.lt.s32.totalorder %s544_s5, %s544_s5 }
  0x3e   :  { %396 = vmatpush3.bf16.msra.mxu0 %v444_v8  ;;  %p551_p9 = por %p550_p8, %p549_p7 }
  0x3f   :  { %397 = vmatprep.subr.bf16.mxu0 %v578_v0  ;;  %416 = vmatpush3.bf16.msra.mxu1 %v452_v23 }
  0x40   :  { %417 = vmatprep.subr.bf16.mxu1 %v578_v0  ;;  %p552_p10 = pnand %p551_p9, %p545_p6 }
  0x42   :  { %398 = vmatpush3.bf16.msra.mxu0 %v445_v10 }
  0x43   :  { %399 = vmatprep.subr.bf16.mxu0 %v578_v0  ;;  %418 = vmatpush3.bf16.msra.mxu1 %v453_v24 }
  0x44   :  { %419 = vmatprep.subr.bf16.mxu1 %v578_v0 }
  0x46   :  { %400 = vmatpush3.bf16.msra.mxu0 %v446_v12 }
  0x47   :  { %401 = vmatprep.subr.bf16.mxu0 %v578_v0  ;;  %420 = vmatpush3.bf16.msra.mxu1 %v454_v25 }
  0x48   :  { %421 = vmatprep.subr.bf16.mxu1 %v578_v0 }
  0x4a   :  { %402 = vmatpush3.bf16.msra.mxu0 %v447_v13 }
  0x4b   :  { %403 = vmatprep.subr.bf16.mxu0 %v578_v0  ;;  %422 = vmatpush3.bf16.msra.mxu1 %v455_v26 }
  0x4c   :  { %423 = vmatprep.subr.bf16.mxu1 %v578_v0 }
  0x4e   :  { %404 = vmatpush3.bf16.msra.mxu0 %v448_v14 }
  0x4f   :  { %405 = vmatprep.subr.bf16.mxu0 %v578_v0  ;;  %424 = vmatpush3.bf16.msra.mxu1 %v456_v27 }
  0x50   :  { %425 = vmatprep.subr.bf16.mxu1 %v578_v0 }
  0x52   :  { %406 = vmatpush3.bf16.msra.mxu0 %v449_v15 }
  0x53   :  { %426 = vmatpush3.bf16.msra.mxu1 %v457_v28 }
  0xa8   :  { %v83_v16 = vpop.permute.xlu0 %82 }
  0xa9   :  { %v94_v17 = vsel %vm93_vm1, %v76_v2, %v83_v16 }
  0xaa   :  { %v91_v19 = vpop.permute.xlu1 %90 }
  0xac   :  { %v87_v18 = vpop.permute.xlu0 %86 }
  0xad   :  { %v96_v20 = vsel %vm95_vm2, %v94_v17, %v87_v18 }
  0xae   :  { %v98_v21 = vsel %vm97_vm3, %v96_v20, %v91_v19 }
  0xaf   :  { %v99_v22 = vpack.c.bf16 %v98_v21, %v98_v21 }
  0xb1   :  { %408 = vmatmul.mubr.bf16.vlgmr.msra.gmra.mxu0 %v99_v22 }
 0x171   :  { %v205_v30 = vpop.f32.mrf.mxu0 }
 0x172   :  { %v206_v31 = vadd.f32 %v355_v29, %v205_v30 }
 0x173   :  { %v409_v32 = vpop.f32.mrf.mxu0 }
 0x174   :  { %v211_v33 = vmul.f32 0.5, %v206_v31 }
 0x175   :  { %v208_v34 = vpop.f32.mrf.mxu0 }
 0x176   :  { %458 = vtanh.f32 %v211_v33 }
 0x177   :  { %v410_v35 = vpop.f32.mrf.mxu0 }
 0x183   :  { %v459_v36 = vpop.eup %458 }
 0x184   :  { %v213_v37 = vadd.f32 1.0, %v459_v36 }
 0x186   :  { %v214_v38 = vmul.f32 0.5, %v213_v37 }
 0x188   :  { %v215_v39 = vpack.c.bf16 %v214_v38, %v214_v38 }
 0x18a   :  { %428 = vmatmul.mubr.bf16.vlgmr.msra.gmra.mxu1 %v215_v39 }
 0x24a   :  { %v321_v41 = vpop.f32.mrf.mxu1 }
 0x24b   :  { %v322_v42 = vadd.f32 %v364_v40, %v321_v41 }
 0x24c   :  { %v429_v43 = vpop.f32.mrf.mxu1 }
 0x24d   :  { %327 = vmax.xlane.f32.xlu1 %v322_v42 }
 0x24e   :  { %v324_v44 = vpop.f32.mrf.mxu1 }
 0x250   :  { %v430_v45 = vpop.f32.mrf.mxu1 }
 0x2d6   :  { %v328_v46 = vpop.xlane.xlu1 %327 }
 0x2d7   :  { %v329_v47 = vsub.f32 %v322_v42, %v328_v46 }
 0x2d9   :  { %v330_v48 = vmul.f32 1.442695, %v329_v47 }
 0x2db   :  { %460 = vpow2.f32 %v330_v48 }
 0x2e8   :  { %v461_v49 = vpop.eup %460 }
 0x2e9   :  { %332 = vadd.xlane.f32.xlu0 %v461_v49 }
 0x372   :  { %v333_v50 = vpop.xlane.xlu0 %332 }
 0x373   :  { %462 = vlog2.f32 %v333_v50 }
 0x380   :  { %v463_v51 = vpop.eup %462 }
 0x381   :  { %v335_v52 = vmul.f32 0.6931472, %v463_v51 }
 0x383   :  { %v336_v53 = vsub.f32 %v329_v47, %v335_v52 }
 0x385   :  { %337 = vst [vmem:[#allocation10] sm:$0xff] %v336_v53 }
 0x386   :  { %555 = shalt.err (!%p552_p10)
}
 0x387   :  { %347 = dma.vmem_to_hbm [thread:$0]  %s345_s21, 128, %s668_s6, [#allocation4]  }
 0x388   :  { %570 = dma.done.wait [#allocation4], 128  }
 0x389   :  { %571 = vsyncadd [#allocation4], 4294967168 }
 0x38a   :  { %351 = vsyncpa [#allocation3], 1 }
 0x38b   :  { %352 = vsyncpa [#allocation6], 1 }
 0x38c   :  { %353 = vsyncpa [#allocation9], 1 }
 0x38d   :  { %354 = vsyncpa [#allocation4], 1 }

</bundles_post_ra>
